<compile_context>
chip_gen: v6e
topology: v6e:2x2x1
jax: 0.10.0
libtpu: 0.0.40
codegen_flags: <defaults>
</compile_context>

<pallas_src>
import functools

import jax
import jax.numpy as jnp
from jax.experimental import pallas as pl
from jax.experimental.pallas import tpu as pltpu


def _uniformity_kernel(e_row_ref, e_col_ref, out_ref, m_ref, l_ref,
                       *, inv_temperature, matmul_dtype):
    """One (batch, row-tile, col-tile) step of online logsumexp over sim/T.

    e_row_ref: (1, tm, D) — resident across the column axis (no per-step work).
    e_col_ref: (1, tn, D) — streamed; 1/T is folded into it here.
    out_ref  : (1, 1, 128) — lane-dense per-row-tile sum of logsumexp.
    m_ref/l_ref: (tm, 1) f32 running max / rescaled sum.
    """
    j = pl.program_id(2)

    # Init the per-row-tile accumulators at the first column step.
    @pl.when(j == 0)
    def _():
        m_ref[...] = jnp.full_like(m_ref, -jnp.inf)
        l_ref[...] = jnp.zeros_like(l_ref)

    # Resident row tile: used as-is (already in matmul dtype; no scale/cast).
    e_r = e_row_ref[0]                                            # (tm, D)
    # Streamed column tile: fold the full 1/T here (scale in f32 for accuracy).
    e_c = (e_col_ref[0].astype(jnp.float32) * inv_temperature
           ).astype(matmul_dtype)                                  # (tn, D)

    # MXU contraction with the RHS contracting dim last — no transpose
    # materialized.  s == sim / T for this tile, f32 accumulation.
    s = jax.lax.dot_general(
        e_r, e_c,
        dimension_numbers=(((1,), (1,)), ((), ())),
        preferred_element_type=jnp.float32,
    )                                                              # (tm, tn)

    # Online (running-max) logsumexp update.  Keep only `p` live as an extra
    # (tm, tn) temporary; everything else is (tm, 1).
    m_prev = m_ref[...]
    m_new = jnp.maximum(m_prev, jnp.max(s, axis=-1, keepdims=True))
    p = jnp.exp(s - m_new)                                         # (tm, tn)
    l_ref[...] = jnp.exp(m_prev - m_new) * l_ref[...] + jnp.sum(
        p, axis=-1, keepdims=True)
    m_ref[...] = m_new

    # Finalize on the last column step: per-row lse, summed over the row tile,
    # written as a lane-dense 128-wide block (unmasked store, cheap DMA).
    @pl.when(j == pl.num_programs(2) - 1)
    def _():
        lse = m_ref[...] + jnp.log(l_ref[...])                     # (tm, 1)
        tile_sum = jnp.sum(lse)                                    # scalar
        out_ref[...] = jnp.broadcast_to(tile_sum, out_ref.shape
                                        ).astype(out_ref.dtype)


def _default_tn():
    """Column tile matched to the MXU width: 256 on v6e/v7x, 128 otherwise."""
    try:
        kind = jax.devices()[0].device_kind.lower()
        if ("v6" in kind) or ("v7" in kind):
            return 256
        return 128
    except Exception:  # pragma: no cover - detection failure, pick safe value
        return 128


def uniformity_loss_batched(embeddings, temperature=0.07, *,
                            block_rows=None, block_cols=None,
                            use_bf16_matmul=False):
    """Batched UniformityLoss: embeddings (B, N, D) -> per-set losses (B,).

    use_bf16_matmul=True casts the MXU operands to bf16 (f32 accumulation);
    only appropriate for normalized / small-norm embeddings at T=0.07.
    """
    b, n, d = embeddings.shape
    tm = block_rows if block_rows is not None else min(n, 1024)
    tn = block_cols if block_cols is not None else min(n, _default_tn())
    assert n % tm == 0 and n % tn == 0, "N must be divisible by the tile sizes"

    matmul_dtype = jnp.bfloat16 if use_bf16_matmul else jnp.float32
    # Cast once in the wrapper (bf16 path halves the streamed column DMA bytes).
    x = embeddings.astype(matmul_dtype)

    n_row_tiles = n // tm
    out = pl.pallas_call(
        functools.partial(
            _uniformity_kernel,
            inv_temperature=1.0 / float(temperature),
            matmul_dtype=matmul_dtype,
        ),
        out_shape=jax.ShapeDtypeStruct((b, n_row_tiles, 128), jnp.float32),
        grid_spec=pltpu.PrefetchScalarGridSpec(
            num_scalar_prefetch=0,
            grid=(b, n_row_tiles, n // tn),        # (batch, row tiles, col tiles)
            in_specs=[
                pl.BlockSpec((1, tm, d), lambda bb, i, j: (bb, i, 0)),  # row blk
                pl.BlockSpec((1, tn, d), lambda bb, i, j: (bb, j, 0)),  # col blk
            ],
            # Output block fixed across j -> resident accumulator pattern;
            # lane-dense (last dim 128) so the writeback is an unmasked store.
            out_specs=pl.BlockSpec((1, 1, 128), lambda bb, i, j: (bb, i, 0)),
            scratch_shapes=[
                pltpu.VMEM((tm, 1), jnp.float32),   # running max m
                pltpu.VMEM((tm, 1), jnp.float32),   # running (rescaled) sum l
            ],
        ),
        compiler_params=pltpu.CompilerParams(
            dimension_semantics=("parallel", "parallel", "arbitrary"),
        ),
    )(x, x)

    # Every lane of out[b, i, :] holds the same per-row-tile lse sum.
    return jnp.sum(out[:, :, 0], axis=-1) / n      # (B,)


def uniformity_loss(embeddings, temperature=0.07, *,
                    block_rows=None, block_cols=None, use_bf16_matmul=False):
    """Single-set UniformityLoss.forward (N, D) -> scalar f32."""
    return uniformity_loss_batched(
        embeddings[None, ...], temperature,
        block_rows=block_rows, block_cols=block_cols,
        use_bf16_matmul=use_bf16_matmul)[0]


# ----------------------------- references ---------------------------------

def uniformity_loss_ref(embeddings, temperature=0.07):
    """Pure-JAX mirror of the PyTorch forward exactly (direct exp; can overflow)."""
    e = embeddings.astype(jnp.float32)
    sim = e @ e.T
    scaled = jnp.exp(sim / temperature)
    return jnp.mean(jnp.log(jnp.sum(scaled, axis=-1)))


def uniformity_loss_stable_ref(embeddings, temperature=0.07):
    """Numerically stable reference (same math, logsumexp form)."""
    e = embeddings.astype(jnp.float32)
    sim = e @ e.T
    return jnp.mean(jax.nn.logsumexp(sim / temperature, axis=-1))


if __name__ == "__main__":
    num_proxy = 8
    embedding_dim = 128
    temperature = 0.07

    key = jax.random.PRNGKey(0)

    # Module-sized input: raw randn embeddings exactly like the PyTorch script.
    emb = jax.random.normal(key, (num_proxy, embedding_dim), dtype=jnp.float32)

    # 1) Full-scale stability check: the direct-exp PyTorch mirror overflows at
    #    this scale, so compare against the stable logsumexp reference.
    loss_full = jax.block_until_ready(uniformity_loss(emb, temperature))
    ref_full = uniformity_loss_stable_ref(emb, temperature)
    assert jnp.allclose(loss_full, ref_full, rtol=1e-5, atol=1e-3), (
        loss_full, ref_full)

    # 2) Exact-semantics check vs. the direct-exp reference: small-magnitude
    #    embeddings keep the unstable reference finite; f32 MXU path, tight tol.
    emb_small = 0.02 * emb
    loss_small = jax.block_until_ready(uniformity_loss(emb_small, temperature))
    ref_small = uniformity_loss_ref(emb_small, temperature)
    assert jnp.allclose(loss_small, ref_small, rtol=1e-5, atol=1e-5), (
        loss_small, ref_small)

    # 3) bf16-MXU path (v6e/v7x optimization) on small-norm embeddings.
    loss_bf16 = jax.block_until_ready(
        uniformity_loss(emb_small, temperature, use_bf16_matmul=True))
    assert jnp.allclose(loss_bf16, ref_small, rtol=5e-2, atol=5e-2), (
        loss_bf16, ref_small)

    # 4) Batched + genuinely tiled path (multiple row/column grid steps,
    #    exercises the online-logsumexp accumulator and lane-dense output).
    emb_batch = jax.random.normal(
        jax.random.PRNGKey(1), (2, 256, embedding_dim), dtype=jnp.float32)
    losses = jax.block_until_ready(
        uniformity_loss_batched(emb_batch, temperature,
                                block_rows=128, block_cols=64))
    refs = jax.vmap(lambda e: uniformity_loss_stable_ref(e, temperature))(
        emb_batch)
    assert jnp.allclose(losses, refs, rtol=1e-5, atol=1e-3), (losses, refs)

    print("KERNEL_OK")
</pallas_src>

<mosaic_0001>
module attributes {stable_mosaic.version = 11 : i64} {
  func.func @_uniformity_kernel(%arg0: i32, %arg1: i32, %arg2: i32, %arg3: memref<1x8x128xf32, #tpu.memory_space<vmem>>, %arg4: memref<1x8x128xf32, #tpu.memory_space<vmem>>, %arg5: memref<1x1x128xf32, #tpu.memory_space<vmem>>, %arg6: memref<8x1xf32, #tpu.memory_space<vmem>>, %arg7: memref<8x1xf32, #tpu.memory_space<vmem>>) attributes {dimension_semantics = [#tpu.dimension_semantics<parallel>, #tpu.dimension_semantics<parallel>, #tpu.dimension_semantics<arbitrary>], iteration_bounds = array<i64: 1, 1, 1>, scalar_prefetch = 0 : i64, scratch_operands = 2 : i64, tpu.core_type = #tpu.core_type<tc>, window_params = [{transform_indices = @transform_0, window_bounds = array<i64: 1, 8, 128>}, {transform_indices = @transform_1, window_bounds = array<i64: 1, 8, 128>}, {transform_indices = @transform_2, window_bounds = array<i64: 1, 1, 128>}]} {
    %c0_i32 = arith.constant 0 : i32
    %0 = arith.cmpi eq, %arg2, %c0_i32 : i32
    %1 = arith.extui %0 : i1 to i32
    %c0_i32_0 = arith.constant 0 : i32
    %2 = arith.cmpi ne, %1, %c0_i32_0 : i32
    scf.if %2 {
      %cst_19 = arith.constant 0xFF800000 : f32
      %29 = vector.broadcast %cst_19 : f32 to vector<8x1xf32>
      %c0_20 = arith.constant 0 : index
      %c0_21 = arith.constant 0 : index
      %30 = vector.load %arg6[%c0_20, %c0_21] : memref<8x1xf32, #tpu.memory_space<vmem>>, vector<8x1xf32>
      tpu.vector_store %arg6[%c0_20, %c0_21], %29 {strides = array<i32>} : memref<8x1xf32, #tpu.memory_space<vmem>>, vector<8x1xf32>,
      %cst_22 = arith.constant 0.000000e+00 : f32
      %31 = vector.broadcast %cst_22 : f32 to vector<8x1xf32>
      %c0_23 = arith.constant 0 : index
      %c0_24 = arith.constant 0 : index
      %32 = vector.load %arg7[%c0_23, %c0_24] : memref<8x1xf32, #tpu.memory_space<vmem>>, vector<8x1xf32>
      tpu.vector_store %arg7[%c0_23, %c0_24], %31 {strides = array<i32>} : memref<8x1xf32, #tpu.memory_space<vmem>>, vector<8x1xf32>,
    } else {
    }
    %c0 = arith.constant 0 : index
    %c0_1 = arith.constant 0 : index
    %c0_2 = arith.constant 0 : index
    %3 = vector.load %arg3[%c0, %c0_1, %c0_2] : memref<1x8x128xf32, #tpu.memory_space<vmem>>, vector<1x8x128xf32>
    %4 = vector.shape_cast %3 : vector<1x8x128xf32> to vector<8x128xf32>
    %c0_3 = arith.constant 0 : index
    %c0_4 = arith.constant 0 : index
    %c0_5 = arith.constant 0 : index
    %5 = vector.load %arg4[%c0_3, %c0_4, %c0_5] : memref<1x8x128xf32, #tpu.memory_space<vmem>>, vector<1x8x128xf32>
    %6 = vector.shape_cast %5 : vector<1x8x128xf32> to vector<8x128xf32>
    %cst = arith.constant 14.2857141 : f32
    %7 = vector.broadcast %cst : f32 to vector<8x128xf32>
    %8 = arith.mulf %6, %7 : vector<8x128xf32>
    %cst_6 = arith.constant dense<0.000000e+00> : vector<8x8xf32>
    %9 = tpu.matmul %4, %8, %cst_6 {dimension_numbers = #tpu.dot_dimension_numbers<[1], [1], [0], [0], [0, 0, 1, 0], [], []>} : vector<8x128xf32>, vector<8x128xf32>, vector<8x8xf32> -> vector<8x8xf32>
    %c0_7 = arith.constant 0 : index
    %c0_8 = arith.constant 0 : index
    %10 = vector.load %arg6[%c0_7, %c0_8] : memref<8x1xf32, #tpu.memory_space<vmem>>, vector<8x1xf32>
    %cst_9 = arith.constant dense<0xFF800000> : vector<8xf32>
    %11 = vector.multi_reduction <maximumf>, %9, %cst_9 [1] : vector<8x8xf32> to vector<8xf32>
    %12 = vector.shape_cast %11 : vector<8xf32> to vector<8x1xf32>
    %13 = arith.maximumf %10, %12 : vector<8x1xf32>
    %14 = vector.broadcast %13 : vector<8x1xf32> to vector<8x8xf32>
    %15 = arith.subf %9, %14 : vector<8x8xf32>
    %16 = math.exp %15 : vector<8x8xf32>
    %17 = arith.subf %10, %13 : vector<8x1xf32>
    %18 = math.exp %17 : vector<8x1xf32>
    %c0_10 = arith.constant 0 : index
    %c0_11 = arith.constant 0 : index
    %19 = vector.load %arg7[%c0_10, %c0_11] : memref<8x1xf32, #tpu.memory_space<vmem>>, vector<8x1xf32>
    %20 = arith.mulf %18, %19 : vector<8x1xf32>
    %cst_12 = arith.constant dense<0.000000e+00> : vector<8xf32>
    %21 = vector.multi_reduction <add>, %16, %cst_12 [1] : vector<8x8xf32> to vector<8xf32>
    %22 = vector.shape_cast %21 : vector<8xf32> to vector<8x1xf32>
    %23 = arith.addf %20, %22 : vector<8x1xf32>
    %c0_13 = arith.constant 0 : index
    %c0_14 = arith.constant 0 : index
    %24 = vector.load %arg7[%c0_13, %c0_14] : memref<8x1xf32, #tpu.memory_space<vmem>>, vector<8x1xf32>
    tpu.vector_store %arg7[%c0_13, %c0_14], %23 {strides = array<i32>} : memref<8x1xf32, #tpu.memory_space<vmem>>, vector<8x1xf32>,
    %c0_15 = arith.constant 0 : index
    %c0_16 = arith.constant 0 : index
    %25 = vector.load %arg6[%c0_15, %c0_16] : memref<8x1xf32, #tpu.memory_space<vmem>>, vector<8x1xf32>
    tpu.vector_store %arg6[%c0_15, %c0_16], %13 {strides = array<i32>} : memref<8x1xf32, #tpu.memory_space<vmem>>, vector<8x1xf32>,
    %c0_i32_17 = arith.constant 0 : i32
    %26 = arith.cmpi eq, %arg2, %c0_i32_17 : i32
    %27 = arith.extui %26 : i1 to i32
    %c0_i32_18 = arith.constant 0 : i32
    %28 = arith.cmpi ne, %27, %c0_i32_18 : i32
    scf.if %28 {
      %c0_19 = arith.constant 0 : index
      %c0_20 = arith.constant 0 : index
      %29 = vector.load %arg6[%c0_19, %c0_20] : memref<8x1xf32, #tpu.memory_space<vmem>>, vector<8x1xf32>
      %c0_21 = arith.constant 0 : index
      %c0_22 = arith.constant 0 : index
      %30 = vector.load %arg7[%c0_21, %c0_22] : memref<8x1xf32, #tpu.memory_space<vmem>>, vector<8x1xf32>
      %31 = math.log %30 : vector<8x1xf32>
      %32 = arith.addf %29, %31 : vector<8x1xf32>
      %33 = vector.shape_cast %32 : vector<8x1xf32> to vector<1x8x1xf32>
      %cst_23 = arith.constant dense<0.000000e+00> : vector<1xf32>
      %34 = vector.multi_reduction <add>, %33, %cst_23 [1, 2] : vector<1x8x1xf32> to vector<1xf32>
      %35 = vector.shape_cast %34 : vector<1xf32> to vector<1x1x1xf32>
      %36 = vector.extract %35[0, 0, 0] : f32 from vector<1x1x1xf32>
      %37 = vector.broadcast %36 : f32 to vector<1x1x128xf32>
      %c0_24 = arith.constant 0 : index
      %c0_25 = arith.constant 0 : index
      %c0_26 = arith.constant 0 : index
      %38 = vector.load %arg5[%c0_24, %c0_25, %c0_26] : memref<1x1x128xf32, #tpu.memory_space<vmem>>, vector<1x1x128xf32>
      tpu.vector_store %arg5[%c0_24, %c0_25, %c0_26], %37 {strides = array<i32>} : memref<1x1x128xf32, #tpu.memory_space<vmem>>, vector<1x1x128xf32>,
    } else {
    }
    return
  }
  func.func @transform_0(%arg0: i32, %arg1: i32, %arg2: i32) -> (i32, i32, i32) {
    %c0_i32 = arith.constant 0 : i32
    %c0_i32_0 = arith.constant 0 : i32
    return %arg0, %arg1, %c0_i32 : i32, i32, i32
  }
  func.func @transform_1(%arg0: i32, %arg1: i32, %arg2: i32) -> (i32, i32, i32) {
    %c0_i32 = arith.constant 0 : i32
    %c0_i32_0 = arith.constant 0 : i32
    return %arg0, %arg2, %c0_i32 : i32, i32, i32
  }
  func.func @transform_2(%arg0: i32, %arg1: i32, %arg2: i32) -> (i32, i32, i32) {
    %c0_i32 = arith.constant 0 : i32
    %c0_i32_0 = arith.constant 0 : i32
    return %arg0, %arg1, %c0_i32 : i32, i32, i32
  }
}

</mosaic_0001>

<bundles_post_ra>
// kernel: tpu_custom_call.1
= control target key start
LH: loop header
LB: loop body
LE: loop exit
PB: predicated region body
PF: predicated region fallthrough
CT: control target
= control target key end

     0   :  { %7 = vsyncpa [#allocation5], 0  ;;  %s305_s0 = inlined_call_operand.hbm [shape: f32[1,8,128], index: 0, kind: input, shape index: {}]   ;;  %s306_s1 = inlined_call_operand.hbm [shape: f32[1,8,128], index: 1, kind: input, shape index: {}]   ;;  %s307_s2 = inlined_call_operand.hbm [shape: f32[1,1,128], index: 2, kind: output, shape index: {}]  }
   0x1   :  { %8 = vsyncpa [#allocation8], 0 }
   0x2   :  { %9 = vsyncpa [#allocation6], 0  ;;  %s267_s9 = smov [#allocation4]   ;;  %s268_s11 = smov [#allocation7]  }
   0x3   :  { %s16_s10 = sshll.u32 %s267_s9, 4  ;;  %s26_s12 = sshll.u32 %s268_s11, 4  ;;  %s17_s10 = int_to_ptr.vmem [resolvable:$true] %s16_s10  ;;  %s27_s12 = int_to_ptr.vmem [resolvable:$true] %s26_s12 }
   0x4   :  { %s209_s13 = scalar_lea.vmem %s17_s10, 128  ;;  %p214_p1 = scmp.lt.s32.totalorder %s17_s10, %s17_s10 }
   0x5   :  { %p210_p0 = scmp.ne.s32.totalorder %s17_s10, %s209_s13  ;;  %p215_p2 = scmp.lt.s32.totalorder %s209_s13, %s209_s13 }
   0x7   :  { %p216_p3 = por %p215_p2, %p214_p1 }
   0x9   :  { %p217_p4 = pnand %p216_p3, %p210_p0 }
   0xb   :  { %220 = shalt.err (!%p217_p4)
}
   0xc   :  { %19 = dma.hbm_to_vmem [thread:$0]  %s305_s0, 128, %s17_s10, [#allocation5]  }
   0xd   :  { %s229_s16 = scalar_lea.vmem %s27_s12, 128  ;;  %p234_p6 = scmp.lt.s32.totalorder %s27_s12, %s27_s12 }
   0xe   :  { %p230_p5 = scmp.ne.s32.totalorder %s27_s12, %s229_s16  ;;  %p235_p7 = scmp.lt.s32.totalorder %s229_s16, %s229_s16 }
  0x10   :  { %p236_p8 = por %p235_p7, %p234_p6 }
  0x12   :  { %p237_p9 = pnand %p236_p8, %p230_p5 }
  0x14   :  { %240 = shalt.err (!%p237_p9)
}
  0x15   :  { %29 = dma.hbm_to_vmem [thread:$0]  %s306_s1, 128, %s27_s12, [#allocation8]  }
  0x16   :  { %261 = dma.done.wait [#allocation5], 128  }
  0x17   :  { %262 = vsyncadd [#allocation5], 4294967168 }
  0x18   :  { %263 = dma.done.wait [#allocation8], 128  }
  0x19   :  { %264 = vsyncadd [#allocation8], 4294967168  ;;  %vm40_vm0 = vcmask 7168   ;;  %v269_v0 = vmov 0.0   ;;  %vm270_vm1 = vmmov 0   ;;  %v44_v1 = vld [vmem:[#allocation7] sm:$0xff] }
  0x1a   :  { %42 = vst.msk [vmem:[#allocation3] sm:$0xff] %vm40_vm0, %v269_v0  ;;  %180 = vmatprep.subr.mxu0 %v269_v0  ;;  %182 = vmatprep.mubr.msk.f32.mxu0 %vm270_vm1, %v269_v0  ;;  %v45_v2 = vmul.f32 14.285714, %v44_v1  ;;  %v43_v3 = vld [vmem:[#allocation4] sm:$0xff]  ;;  %v271_v4 = vmov -inf   ;;  %vm117_vm2 = vcmask 64512  }
  0x1b   :  { %41 = vst.msk [vmem:[#allocation2] sm:$0xff] %vm40_vm0, %v271_v4  ;;  %v272_v8 = vmov 0   ;;  %s273_s0 = smov [#allocation9]  }
  0x1c   :  { %181 = vmatpush3.xpose.msra.mxu0 %v45_v2  ;;  %194 = vset.pattern.permute.xlu0 %v272_v8  ;;  %s168_s1 = sshll.u32 %s273_s0, 4  ;;  %s169_s1 = int_to_ptr.vmem [resolvable:$true] %s168_s1 }
  0x1d   :  { %s241_s20 = scalar_lea.vmem %s169_s1, 16  ;;  %s245_s21 = scalar_lea.vmem %s169_s1, 32 }
  0x1e   :  { %p242_p10 = scmp.ne.s32.totalorder %s169_s1, %s241_s20  ;;  %p246_p11 = scmp.lt.s32.totalorder %s169_s1, %s169_s1 }
  0x1f   :  { %183 = vmatmul.mubr.f32.vlgmr.msra.gmra.mxu0 %v43_v3  ;;  %p247_p12 = scmp.lt.s32.totalorder %s245_s21, %s241_s20 }
  0x21   :  { %v133_v20 = vld [vmem:[#allocation3] sm:$0xff]  ;;  %p248_p13 = por %p247_p12, %p246_p11 }
  0x22   :  { %v116_v9 = vld [vmem:[#allocation2] sm:$0xff] }
  0x23   :  { %p249_p0 = pnand %p248_p13, %p242_p10 }
  0xdf   :  { %v112_v5 = vpop.f32.mrf.mxu0 }
  0xe0   :  { %v118_v6 = vsel %vm117_vm2, %v112_v5, -inf }
  0xe1   :  { %119 = vmax.xlane.f32.xlu0 %v118_v6  ;;  %v184_v7 = vpop.f32.mrf.mxu0 }
 0x16a   :  { %v120_v10 = vpop.xlane.xlu0 %119 }
 0x16b   :  { %v121_v11 = vmax.f32 %v116_v9, %v120_v10 }
 0x16d   :  { %v130_v12 = vsub.f32 %v116_v9, %v121_v11  ;;  %141 = vst.msk [vmem:[#allocation2] sm:$0xff] %vm40_vm0, %v121_v11  ;;  %124 = vperm.xlu0 %194, %v121_v11  }
 0x16f   :  { %v131_v18 = vmul.f32 1.442695, %v130_v12 }
 0x174   :  { %v145_v27 = vld [vmem:[#allocation2] sm:$0xff] }
 0x1e8   :  { %v125_v13 = vpop.permute.xlu0 %124 }
 0x1e9   :  { %v127_v14 = vsub.f32 %v112_v5, %v125_v13 }
 0x1eb   :  { %v128_v15 = vmul.f32 1.442695, %v127_v14 }
 0x1ed   :  { %195 = vpow2.f32 %v128_v15 }
 0x1ee   :  { %197 = vpow2.f32 %v131_v18 }
 0x1fa   :  { %v196_v16 = vpop.eup %195 }
 0x1fb   :  { %v135_v17 = vsel %vm117_vm2, %v196_v16, 0.0  ;;  %v198_v19 = vpop.eup %197 }
 0x1fc   :  { %136 = vadd.xlane.f32.xlu1 %v135_v17  ;;  %v134_v21 = vmul.f32 %v198_v19, %v133_v20 }
 0x285   :  { %v137_v22 = vpop.xlane.xlu1 %136 }
 0x286   :  { %v138_v23 = vadd.f32 %v137_v22, %v134_v21 }
 0x288   :  { %140 = vst.msk [vmem:[#allocation3] sm:$0xff] %vm40_vm0, %v138_v23 }
 0x28f   :  { %v146_v24 = vld [vmem:[#allocation3] sm:$0xff] }
 0x290   :  { %199 = vlog2.f32 %v146_v24 }
 0x29d   :  { %v200_v25 = vpop.eup %199 }
 0x29e   :  { %v148_v26 = vmul.f32 0.6931472, %v200_v25 }
 0x2a0   :  { %v149_v28 = vadd.f32 %v148_v26, %v145_v27 }
 0x2a2   :  { %v150_v29 = vsel %vm40_vm0, %v149_v28, 0.0 }
 0x2a3   :  { %151 = vadd.xlane.f32.xlu1 %v150_v29 }
 0x32c   :  { %v152_v30 = vpop.xlane.xlu1 %151 }
 0x32d   :  { %v153_v31 = vrot.slane %v152_v30, 4 }
 0x32f   :  { %v154_v32 = vadd.f32 %v153_v31, %v152_v30 }
 0x331   :  { %v155_v33 = vrot.slane %v154_v32, 2 }
 0x333   :  { %v156_v34 = vadd.f32 %v155_v33, %v154_v32 }
 0x335   :  { %v157_v35 = vrot.slane %v156_v34, 1 }
 0x337   :  { %v158_v36 = vadd.f32 %v157_v35, %v156_v34 }
 0x339   :  { %185 = vpush %v158_v36 }
 0x36a   :  { %s186_s19 = spop %185 }
 0x36b   :  { %v160_v37 = vstv %s186_s19 }
 0x36c   :  { %161 = vst [vmem:[#allocation9] sm:$0x1] %v160_v37 }
 0x36d   :  { %252 = shalt.err (!%p249_p0)
}
 0x36e   :  { %171 = dma.vmem_to_hbm [thread:$0]  %s169_s1, 16, %s307_s2, [#allocation6]  }
 0x36f   :  { %265 = dma.done.wait [#allocation6], 16  }
 0x370   :  { %266 = vsyncadd [#allocation6], 4294967280 }
 0x371   :  { %175 = vsyncpa [#allocation5], 1 }
 0x372   :  { %176 = vsyncpa [#allocation8], 1 }
 0x373   :  { %177 = vsyncpa [#allocation6], 1 }

</bundles_post_ra>
